<compile_context>
chip_gen: v5e
topology: v5e:2x2
jax: 0.10.0
libtpu: 0.0.40
codegen_flags: <defaults>
</compile_context>

<pallas_src>
import jax
import jax.numpy as jnp
from jax import lax
from jax.experimental import pallas as pl
from jax.experimental.pallas import tpu as pltpu

# ---- small, module-consistent config (dim divisible by num_heads) ----
B = 2          # batch
N = 16         # sequence length (tokens)
C = 64         # embedding dim ("dim")
NUM_HEADS = 4  # "num_heads"
HEAD_DIM = C // NUM_HEADS
SCALE = HEAD_DIM ** (-0.5)   # qk_scale default: head_dim ** -0.5


def attention_kernel(x_ref, wqkv_ref, wproj_ref, bproj_ref, o_ref):
    """Single grid step: whole batch fused. x_ref is (B*N, C)."""
    x = x_ref[...]            # (B*N, C)
    wqkv = wqkv_ref[...]      # (C, 3C)
    wproj = wproj_ref[...]    # (C, C)
    bias = bproj_ref[...]     # (1, C)

    # Fused QKV projection over the whole batch (qkv_bias=False in module defaults).
    qkv = jnp.dot(x, wqkv, preferred_element_type=jnp.float32)      # (B*N, 3C)

    for b in range(B):                       # static unroll over batch
        r0 = b * N
        acc = jnp.zeros((N, C), dtype=jnp.float32)
        for h in range(NUM_HEADS):           # static unroll over heads
            c0 = h * HEAD_DIM
            q = qkv[r0:r0 + N, c0:c0 + HEAD_DIM]                     # (N, hd)
            k = qkv[r0:r0 + N, C + c0:C + c0 + HEAD_DIM]             # (N, hd)
            v = qkv[r0:r0 + N, 2 * C + c0:2 * C + c0 + HEAD_DIM]     # (N, hd)

            # q @ k^T with contraction over the last dims -> no explicit transpose.
            s = lax.dot_general(q, k, (((1,), (1,)), ((), ())),
                                preferred_element_type=jnp.float32) * SCALE   # (N, N)

            # numerically-stable softmax over the last axis
            s = s - jnp.max(s, axis=-1, keepdims=True)
            p = jnp.exp(s)
            p = p * pl.reciprocal(jnp.sum(p, axis=-1, keepdims=True), approx=True)

            o_h = jnp.dot(p, v, preferred_element_type=jnp.float32)  # (N, hd)
            # Fold the output projection into the head loop (no concatenate).
            acc = acc + jnp.dot(o_h, wproj[c0:c0 + HEAD_DIM, :],
                                preferred_element_type=jnp.float32)  # (N, C)

        o_ref[r0:r0 + N, :] = (acc + bias).astype(o_ref.dtype)


@jax.jit
def attention_forward(x, w_qkv, w_proj, b_proj):
    """x: (B, N, C); w_qkv: (C, 3C); w_proj: (C, C); b_proj: (1, C)."""
    Bsz, n, c = x.shape
    x2d = x.reshape(Bsz * n, c)              # fuse batch & sequence for the QKV matmul
    out2d = pl.pallas_call(
        attention_kernel,
        out_shape=jax.ShapeDtypeStruct((Bsz * n, c), jnp.float32),
        grid=(1,),
        in_specs=[
            pl.BlockSpec((Bsz * n, c), lambda i: (0, 0)),     # x (full block)
            pl.BlockSpec((c, 3 * c), lambda i: (0, 0)),       # qkv weight (resident)
            pl.BlockSpec((c, c), lambda i: (0, 0)),           # proj weight (resident)
            pl.BlockSpec((1, c), lambda i: (0, 0)),           # proj bias
        ],
        out_specs=pl.BlockSpec((Bsz * n, c), lambda i: (0, 0)),
        compiler_params=pltpu.CompilerParams(
            dimension_semantics=("arbitrary",)),
    )(x2d, w_qkv, w_proj, b_proj)
    return out2d.reshape(Bsz, n, c)


def attention_reference(x, w_qkv, w_proj, b_proj):
    """Pure-JAX reference mirroring the PyTorch forward exactly."""
    Bsz, n, c = x.shape
    qkv = x @ w_qkv                                                   # (B, N, 3C)
    qkv = qkv.reshape(Bsz, n, 3, NUM_HEADS, c // NUM_HEADS)
    qkv = jnp.transpose(qkv, (2, 0, 3, 1, 4))                         # (3, B, H, N, hd)
    q, k, v = qkv[0], qkv[1], qkv[2]
    s = jnp.einsum("bhnd,bhmd->bhnm", q, k) * SCALE
    p = jax.nn.softmax(s, axis=-1)
    o = jnp.einsum("bhnm,bhmd->bhnd", p, v)
    o = jnp.transpose(o, (0, 2, 1, 3)).reshape(Bsz, n, c)
    return o @ w_proj + b_proj[0]


if __name__ == "__main__":
    key = jax.random.PRNGKey(0)
    kx, kqkv, kp, kb = jax.random.split(key, 4)

    # deterministic synthetic parameters (nn.Linear weights stored transposed: (in, out))
    x = jax.random.normal(kx, (B, N, C), dtype=jnp.float32)
    w_qkv = jax.random.normal(kqkv, (C, 3 * C), dtype=jnp.float32) * 0.02
    w_proj = jax.random.normal(kp, (C, C), dtype=jnp.float32) * 0.02
    b_proj = jax.random.normal(kb, (1, C), dtype=jnp.float32) * 0.02

    out = attention_forward(x, w_qkv, w_proj, b_proj)
    out = jax.block_until_ready(out)

    ref = attention_reference(x, w_qkv, w_proj, b_proj)
    assert out.shape == (B, N, C)
    # tolerance relaxed to 1e-3 because of the approx reciprocal in the softmax denom
    assert jnp.allclose(out, ref, atol=1e-3, rtol=1e-3), "mismatch vs reference"

    print("KERNEL_OK")
</pallas_src>

<mosaic_0001>
module attributes {stable_mosaic.version = 11 : i64} {
  func.func @attention_kernel(%arg0: i32, %arg1: memref<32x64xf32, #tpu.memory_space<vmem>>, %arg2: memref<64x192xf32, #tpu.memory_space<vmem>>, %arg3: memref<64x64xf32, #tpu.memory_space<vmem>>, %arg4: memref<1x64xf32, #tpu.memory_space<vmem>>, %arg5: memref<32x64xf32, #tpu.memory_space<vmem>>) attributes {dimension_semantics = [#tpu.dimension_semantics<arbitrary>], iteration_bounds = array<i64: 1>, scalar_prefetch = 0 : i64, scratch_operands = 0 : i64, tpu.core_type = #tpu.core_type<tc>, window_params = [{pipeline_mode = #tpu.pipeline_mode<synchronous>, transform_indices = @transform_0, window_bounds = array<i64: 32, 64>}, {pipeline_mode = #tpu.pipeline_mode<synchronous>, transform_indices = @transform_1, window_bounds = array<i64: 64, 192>}, {pipeline_mode = #tpu.pipeline_mode<synchronous>, transform_indices = @transform_2, window_bounds = array<i64: 64, 64>}, {pipeline_mode = #tpu.pipeline_mode<synchronous>, transform_indices = @transform_3, window_bounds = array<i64: 1, 64>}, {pipeline_mode = #tpu.pipeline_mode<synchronous>, transform_indices = @transform_4, window_bounds = array<i64: 32, 64>}]} {
    %c0 = arith.constant 0 : index
    %c0_0 = arith.constant 0 : index
    %0 = vector.load %arg1[%c0, %c0_0] : memref<32x64xf32, #tpu.memory_space<vmem>>, vector<32x64xf32>
    %c0_1 = arith.constant 0 : index
    %c0_2 = arith.constant 0 : index
    %1 = vector.load %arg2[%c0_1, %c0_2] : memref<64x192xf32, #tpu.memory_space<vmem>>, vector<64x192xf32>
    %c0_3 = arith.constant 0 : index
    %c0_4 = arith.constant 0 : index
    %2 = vector.load %arg3[%c0_3, %c0_4] : memref<64x64xf32, #tpu.memory_space<vmem>>, vector<64x64xf32>
    %c0_5 = arith.constant 0 : index
    %c0_6 = arith.constant 0 : index
    %3 = vector.load %arg4[%c0_5, %c0_6] : memref<1x64xf32, #tpu.memory_space<vmem>>, vector<1x64xf32>
    %cst = arith.constant dense<0.000000e+00> : vector<32x192xf32>
    %4 = tpu.matmul %0, %1, %cst {dimension_numbers = #tpu.dot_dimension_numbers<[1], [0], [0], [1], [0, 0, 1, 1], [], []>} : vector<32x64xf32>, vector<64x192xf32>, vector<32x192xf32> -> vector<32x192xf32>
    %cst_7 = arith.constant 0.000000e+00 : f32
    %5 = vector.broadcast %cst_7 : f32 to vector<16x64xf32>
    %6 = vector.extract_strided_slice %4 {offsets = [0, 0], sizes = [16, 16], strides = [1, 1]} : vector<32x192xf32> to vector<16x16xf32>
    %7 = vector.extract_strided_slice %4 {offsets = [0, 64], sizes = [16, 16], strides = [1, 1]} : vector<32x192xf32> to vector<16x16xf32>
    %8 = vector.extract_strided_slice %4 {offsets = [0, 128], sizes = [16, 16], strides = [1, 1]} : vector<32x192xf32> to vector<16x16xf32>
    %cst_8 = arith.constant dense<0.000000e+00> : vector<16x16xf32>
    %9 = tpu.matmul %6, %7, %cst_8 {dimension_numbers = #tpu.dot_dimension_numbers<[1], [1], [0], [0], [0, 0, 1, 0], [], []>} : vector<16x16xf32>, vector<16x16xf32>, vector<16x16xf32> -> vector<16x16xf32>
    %cst_9 = arith.constant 2.500000e-01 : f32
    %10 = vector.broadcast %cst_9 : f32 to vector<16x16xf32>
    %11 = arith.mulf %9, %10 : vector<16x16xf32>
    %cst_10 = arith.constant dense<0xFF800000> : vector<16xf32>
    %12 = vector.multi_reduction <maximumf>, %11, %cst_10 [1] : vector<16x16xf32> to vector<16xf32>
    %13 = vector.shape_cast %12 : vector<16xf32> to vector<16x1xf32>
    %14 = vector.broadcast %13 : vector<16x1xf32> to vector<16x16xf32>
    %15 = arith.subf %11, %14 : vector<16x16xf32>
    %16 = math.exp %15 : vector<16x16xf32>
    %cst_11 = arith.constant dense<0.000000e+00> : vector<16xf32>
    %17 = vector.multi_reduction <add>, %16, %cst_11 [1] : vector<16x16xf32> to vector<16xf32>
    %18 = vector.shape_cast %17 : vector<16xf32> to vector<16x1xf32>
    %19 = tpu.reciprocal %18 {approx = true} : vector<16x1xf32> -> vector<16x1xf32>
    %20 = vector.broadcast %19 : vector<16x1xf32> to vector<16x16xf32>
    %21 = arith.mulf %16, %20 : vector<16x16xf32>
    %cst_12 = arith.constant dense<0.000000e+00> : vector<16x16xf32>
    %22 = tpu.matmul %21, %8, %cst_12 {dimension_numbers = #tpu.dot_dimension_numbers<[1], [0], [0], [1], [0, 0, 1, 1], [], []>} : vector<16x16xf32>, vector<16x16xf32>, vector<16x16xf32> -> vector<16x16xf32>
    %23 = vector.extract_strided_slice %2 {offsets = [0, 0], sizes = [16, 64], strides = [1, 1]} : vector<64x64xf32> to vector<16x64xf32>
    %cst_13 = arith.constant dense<0.000000e+00> : vector<16x64xf32>
    %24 = tpu.matmul %22, %23, %cst_13 {dimension_numbers = #tpu.dot_dimension_numbers<[1], [0], [0], [1], [0, 0, 1, 1], [], []>} : vector<16x16xf32>, vector<16x64xf32>, vector<16x64xf32> -> vector<16x64xf32>
    %25 = arith.addf %5, %24 : vector<16x64xf32>
    %26 = vector.extract_strided_slice %4 {offsets = [0, 16], sizes = [16, 16], strides = [1, 1]} : vector<32x192xf32> to vector<16x16xf32>
    %27 = vector.extract_strided_slice %4 {offsets = [0, 80], sizes = [16, 16], strides = [1, 1]} : vector<32x192xf32> to vector<16x16xf32>
    %28 = vector.extract_strided_slice %4 {offsets = [0, 144], sizes = [16, 16], strides = [1, 1]} : vector<32x192xf32> to vector<16x16xf32>
    %cst_14 = arith.constant dense<0.000000e+00> : vector<16x16xf32>
    %29 = tpu.matmul %26, %27, %cst_14 {dimension_numbers = #tpu.dot_dimension_numbers<[1], [1], [0], [0], [0, 0, 1, 0], [], []>} : vector<16x16xf32>, vector<16x16xf32>, vector<16x16xf32> -> vector<16x16xf32>
    %cst_15 = arith.constant 2.500000e-01 : f32
    %30 = vector.broadcast %cst_15 : f32 to vector<16x16xf32>
    %31 = arith.mulf %29, %30 : vector<16x16xf32>
    %cst_16 = arith.constant dense<0xFF800000> : vector<16xf32>
    %32 = vector.multi_reduction <maximumf>, %31, %cst_16 [1] : vector<16x16xf32> to vector<16xf32>
    %33 = vector.shape_cast %32 : vector<16xf32> to vector<16x1xf32>
    %34 = vector.broadcast %33 : vector<16x1xf32> to vector<16x16xf32>
    %35 = arith.subf %31, %34 : vector<16x16xf32>
    %36 = math.exp %35 : vector<16x16xf32>
    %cst_17 = arith.constant dense<0.000000e+00> : vector<16xf32>
    %37 = vector.multi_reduction <add>, %36, %cst_17 [1] : vector<16x16xf32> to vector<16xf32>
    %38 = vector.shape_cast %37 : vector<16xf32> to vector<16x1xf32>
    %39 = tpu.reciprocal %38 {approx = true} : vector<16x1xf32> -> vector<16x1xf32>
    %40 = vector.broadcast %39 : vector<16x1xf32> to vector<16x16xf32>
    %41 = arith.mulf %36, %40 : vector<16x16xf32>
    %cst_18 = arith.constant dense<0.000000e+00> : vector<16x16xf32>
    %42 = tpu.matmul %41, %28, %cst_18 {dimension_numbers = #tpu.dot_dimension_numbers<[1], [0], [0], [1], [0, 0, 1, 1], [], []>} : vector<16x16xf32>, vector<16x16xf32>, vector<16x16xf32> -> vector<16x16xf32>
    %43 = vector.extract_strided_slice %2 {offsets = [16, 0], sizes = [16, 64], strides = [1, 1]} : vector<64x64xf32> to vector<16x64xf32>
    %cst_19 = arith.constant dense<0.000000e+00> : vector<16x64xf32>
    %44 = tpu.matmul %42, %43, %cst_19 {dimension_numbers = #tpu.dot_dimension_numbers<[1], [0], [0], [1], [0, 0, 1, 1], [], []>} : vector<16x16xf32>, vector<16x64xf32>, vector<16x64xf32> -> vector<16x64xf32>
    %45 = arith.addf %25, %44 : vector<16x64xf32>
    %46 = vector.extract_strided_slice %4 {offsets = [0, 32], sizes = [16, 16], strides = [1, 1]} : vector<32x192xf32> to vector<16x16xf32>
    %47 = vector.extract_strided_slice %4 {offsets = [0, 96], sizes = [16, 16], strides = [1, 1]} : vector<32x192xf32> to vector<16x16xf32>
    %48 = vector.extract_strided_slice %4 {offsets = [0, 160], sizes = [16, 16], strides = [1, 1]} : vector<32x192xf32> to vector<16x16xf32>
    %cst_20 = arith.constant dense<0.000000e+00> : vector<16x16xf32>
    %49 = tpu.matmul %46, %47, %cst_20 {dimension_numbers = #tpu.dot_dimension_numbers<[1], [1], [0], [0], [0, 0, 1, 0], [], []>} : vector<16x16xf32>, vector<16x16xf32>, vector<16x16xf32> -> vector<16x16xf32>
    %cst_21 = arith.constant 2.500000e-01 : f32
    %50 = vector.broadcast %cst_21 : f32 to vector<16x16xf32>
    %51 = arith.mulf %49, %50 : vector<16x16xf32>
    %cst_22 = arith.constant dense<0xFF800000> : vector<16xf32>
    %52 = vector.multi_reduction <maximumf>, %51, %cst_22 [1] : vector<16x16xf32> to vector<16xf32>
    %53 = vector.shape_cast %52 : vector<16xf32> to vector<16x1xf32>
    %54 = vector.broadcast %53 : vector<16x1xf32> to vector<16x16xf32>
    %55 = arith.subf %51, %54 : vector<16x16xf32>
    %56 = math.exp %55 : vector<16x16xf32>
    %cst_23 = arith.constant dense<0.000000e+00> : vector<16xf32>
    %57 = vector.multi_reduction <add>, %56, %cst_23 [1] : vector<16x16xf32> to vector<16xf32>
    %58 = vector.shape_cast %57 : vector<16xf32> to vector<16x1xf32>
    %59 = tpu.reciprocal %58 {approx = true} : vector<16x1xf32> -> vector<16x1xf32>
    %60 = vector.broadcast %59 : vector<16x1xf32> to vector<16x16xf32>
    %61 = arith.mulf %56, %60 : vector<16x16xf32>
    %cst_24 = arith.constant dense<0.000000e+00> : vector<16x16xf32>
    %62 = tpu.matmul %61, %48, %cst_24 {dimension_numbers = #tpu.dot_dimension_numbers<[1], [0], [0], [1], [0, 0, 1, 1], [], []>} : vector<16x16xf32>, vector<16x16xf32>, vector<16x16xf32> -> vector<16x16xf32>
    %63 = vector.extract_strided_slice %2 {offsets = [32, 0], sizes = [16, 64], strides = [1, 1]} : vector<64x64xf32> to vector<16x64xf32>
    %cst_25 = arith.constant dense<0.000000e+00> : vector<16x64xf32>
    %64 = tpu.matmul %62, %63, %cst_25 {dimension_numbers = #tpu.dot_dimension_numbers<[1], [0], [0], [1], [0, 0, 1, 1], [], []>} : vector<16x16xf32>, vector<16x64xf32>, vector<16x64xf32> -> vector<16x64xf32>
    %65 = arith.addf %45, %64 : vector<16x64xf32>
    %66 = vector.extract_strided_slice %4 {offsets = [0, 48], sizes = [16, 16], strides = [1, 1]} : vector<32x192xf32> to vector<16x16xf32>
    %67 = vector.extract_strided_slice %4 {offsets = [0, 112], sizes = [16, 16], strides = [1, 1]} : vector<32x192xf32> to vector<16x16xf32>
    %68 = vector.extract_strided_slice %4 {offsets = [0, 176], sizes = [16, 16], strides = [1, 1]} : vector<32x192xf32> to vector<16x16xf32>
    %cst_26 = arith.constant dense<0.000000e+00> : vector<16x16xf32>
    %69 = tpu.matmul %66, %67, %cst_26 {dimension_numbers = #tpu.dot_dimension_numbers<[1], [1], [0], [0], [0, 0, 1, 0], [], []>} : vector<16x16xf32>, vector<16x16xf32>, vector<16x16xf32> -> vector<16x16xf32>
    %cst_27 = arith.constant 2.500000e-01 : f32
    %70 = vector.broadcast %cst_27 : f32 to vector<16x16xf32>
    %71 = arith.mulf %69, %70 : vector<16x16xf32>
    %cst_28 = arith.constant dense<0xFF800000> : vector<16xf32>
    %72 = vector.multi_reduction <maximumf>, %71, %cst_28 [1] : vector<16x16xf32> to vector<16xf32>
    %73 = vector.shape_cast %72 : vector<16xf32> to vector<16x1xf32>
    %74 = vector.broadcast %73 : vector<16x1xf32> to vector<16x16xf32>
    %75 = arith.subf %71, %74 : vector<16x16xf32>
    %76 = math.exp %75 : vector<16x16xf32>
    %cst_29 = arith.constant dense<0.000000e+00> : vector<16xf32>
    %77 = vector.multi_reduction <add>, %76, %cst_29 [1] : vector<16x16xf32> to vector<16xf32>
    %78 = vector.shape_cast %77 : vector<16xf32> to vector<16x1xf32>
    %79 = tpu.reciprocal %78 {approx = true} : vector<16x1xf32> -> vector<16x1xf32>
    %80 = vector.broadcast %79 : vector<16x1xf32> to vector<16x16xf32>
    %81 = arith.mulf %76, %80 : vector<16x16xf32>
    %cst_30 = arith.constant dense<0.000000e+00> : vector<16x16xf32>
    %82 = tpu.matmul %81, %68, %cst_30 {dimension_numbers = #tpu.dot_dimension_numbers<[1], [0], [0], [1], [0, 0, 1, 1], [], []>} : vector<16x16xf32>, vector<16x16xf32>, vector<16x16xf32> -> vector<16x16xf32>
    %83 = vector.extract_strided_slice %2 {offsets = [48, 0], sizes = [16, 64], strides = [1, 1]} : vector<64x64xf32> to vector<16x64xf32>
    %cst_31 = arith.constant dense<0.000000e+00> : vector<16x64xf32>
    %84 = tpu.matmul %82, %83, %cst_31 {dimension_numbers = #tpu.dot_dimension_numbers<[1], [0], [0], [1], [0, 0, 1, 1], [], []>} : vector<16x16xf32>, vector<16x64xf32>, vector<16x64xf32> -> vector<16x64xf32>
    %85 = arith.addf %65, %84 : vector<16x64xf32>
    %86 = vector.broadcast %3 : vector<1x64xf32> to vector<16x64xf32>
    %87 = arith.addf %85, %86 : vector<16x64xf32>
    %c0_32 = arith.constant 0 : index
    %c0_33 = arith.constant 0 : index
    %88 = vector.load %arg5[%c0_32, %c0_33] : memref<32x64xf32, #tpu.memory_space<vmem>>, vector<16x64xf32>
    tpu.vector_store %arg5[%c0_32, %c0_33], %87 {strides = array<i32>} : memref<32x64xf32, #tpu.memory_space<vmem>>, vector<16x64xf32>,
    %cst_34 = arith.constant 0.000000e+00 : f32
    %89 = vector.broadcast %cst_34 : f32 to vector<16x64xf32>
    %90 = vector.extract_strided_slice %4 {offsets = [16, 0], sizes = [16, 16], strides = [1, 1]} : vector<32x192xf32> to vector<16x16xf32>
    %91 = vector.extract_strided_slice %4 {offsets = [16, 64], sizes = [16, 16], strides = [1, 1]} : vector<32x192xf32> to vector<16x16xf32>
    %92 = vector.extract_strided_slice %4 {offsets = [16, 128], sizes = [16, 16], strides = [1, 1]} : vector<32x192xf32> to vector<16x16xf32>
    %cst_35 = arith.constant dense<0.000000e+00> : vector<16x16xf32>
    %93 = tpu.matmul %90, %91, %cst_35 {dimension_numbers = #tpu.dot_dimension_numbers<[1], [1], [0], [0], [0, 0, 1, 0], [], []>} : vector<16x16xf32>, vector<16x16xf32>, vector<16x16xf32> -> vector<16x16xf32>
    %cst_36 = arith.constant 2.500000e-01 : f32
    %94 = vector.broadcast %cst_36 : f32 to vector<16x16xf32>
    %95 = arith.mulf %93, %94 : vector<16x16xf32>
    %cst_37 = arith.constant dense<0xFF800000> : vector<16xf32>
    %96 = vector.multi_reduction <maximumf>, %95, %cst_37 [1] : vector<16x16xf32> to vector<16xf32>
    %97 = vector.shape_cast %96 : vector<16xf32> to vector<16x1xf32>
    %98 = vector.broadcast %97 : vector<16x1xf32> to vector<16x16xf32>
    %99 = arith.subf %95, %98 : vector<16x16xf32>
    %100 = math.exp %99 : vector<16x16xf32>
    %cst_38 = arith.constant dense<0.000000e+00> : vector<16xf32>
    %101 = vector.multi_reduction <add>, %100, %cst_38 [1] : vector<16x16xf32> to vector<16xf32>
    %102 = vector.shape_cast %101 : vector<16xf32> to vector<16x1xf32>
    %103 = tpu.reciprocal %102 {approx = true} : vector<16x1xf32> -> vector<16x1xf32>
    %104 = vector.broadcast %103 : vector<16x1xf32> to vector<16x16xf32>
    %105 = arith.mulf %100, %104 : vector<16x16xf32>
    %cst_39 = arith.constant dense<0.000000e+00> : vector<16x16xf32>
    %106 = tpu.matmul %105, %92, %cst_39 {dimension_numbers = #tpu.dot_dimension_numbers<[1], [0], [0], [1], [0, 0, 1, 1], [], []>} : vector<16x16xf32>, vector<16x16xf32>, vector<16x16xf32> -> vector<16x16xf32>
    %107 = vector.extract_strided_slice %2 {offsets = [0, 0], sizes = [16, 64], strides = [1, 1]} : vector<64x64xf32> to vector<16x64xf32>
    %cst_40 = arith.constant dense<0.000000e+00> : vector<16x64xf32>
    %108 = tpu.matmul %106, %107, %cst_40 {dimension_numbers = #tpu.dot_dimension_numbers<[1], [0], [0], [1], [0, 0, 1, 1], [], []>} : vector<16x16xf32>, vector<16x64xf32>, vector<16x64xf32> -> vector<16x64xf32>
    %109 = arith.addf %89, %108 : vector<16x64xf32>
    %110 = vector.extract_strided_slice %4 {offsets = [16, 16], sizes = [16, 16], strides = [1, 1]} : vector<32x192xf32> to vector<16x16xf32>
    %111 = vector.extract_strided_slice %4 {offsets = [16, 80], sizes = [16, 16], strides = [1, 1]} : vector<32x192xf32> to vector<16x16xf32>
    %112 = vector.extract_strided_slice %4 {offsets = [16, 144], sizes = [16, 16], strides = [1, 1]} : vector<32x192xf32> to vector<16x16xf32>
    %cst_41 = arith.constant dense<0.000000e+00> : vector<16x16xf32>
    %113 = tpu.matmul %110, %111, %cst_41 {dimension_numbers = #tpu.dot_dimension_numbers<[1], [1], [0], [0], [0, 0, 1, 0], [], []>} : vector<16x16xf32>, vector<16x16xf32>, vector<16x16xf32> -> vector<16x16xf32>
    %cst_42 = arith.constant 2.500000e-01 : f32
    %114 = vector.broadcast %cst_42 : f32 to vector<16x16xf32>
    %115 = arith.mulf %113, %114 : vector<16x16xf32>
    %cst_43 = arith.constant dense<0xFF800000> : vector<16xf32>
    %116 = vector.multi_reduction <maximumf>, %115, %cst_43 [1] : vector<16x16xf32> to vector<16xf32>
    %117 = vector.shape_cast %116 : vector<16xf32> to vector<16x1xf32>
    %118 = vector.broadcast %117 : vector<16x1xf32> to vector<16x16xf32>
    %119 = arith.subf %115, %118 : vector<16x16xf32>
    %120 = math.exp %119 : vector<16x16xf32>
    %cst_44 = arith.constant dense<0.000000e+00> : vector<16xf32>
    %121 = vector.multi_reduction <add>, %120, %cst_44 [1] : vector<16x16xf32> to vector<16xf32>
    %122 = vector.shape_cast %121 : vector<16xf32> to vector<16x1xf32>
    %123 = tpu.reciprocal %122 {approx = true} : vector<16x1xf32> -> vector<16x1xf32>
    %124 = vector.broadcast %123 : vector<16x1xf32> to vector<16x16xf32>
    %125 = arith.mulf %120, %124 : vector<16x16xf32>
    %cst_45 = arith.constant dense<0.000000e+00> : vector<16x16xf32>
    %126 = tpu.matmul %125, %112, %cst_45 {dimension_numbers = #tpu.dot_dimension_numbers<[1], [0], [0], [1], [0, 0, 1, 1], [], []>} : vector<16x16xf32>, vector<16x16xf32>, vector<16x16xf32> -> vector<16x16xf32>
    %127 = vector.extract_strided_slice %2 {offsets = [16, 0], sizes = [16, 64], strides = [1, 1]} : vector<64x64xf32> to vector<16x64xf32>
    %cst_46 = arith.constant dense<0.000000e+00> : vector<16x64xf32>
    %128 = tpu.matmul %126, %127, %cst_46 {dimension_numbers = #tpu.dot_dimension_numbers<[1], [0], [0], [1], [0, 0, 1, 1], [], []>} : vector<16x16xf32>, vector<16x64xf32>, vector<16x64xf32> -> vector<16x64xf32>
    %129 = arith.addf %109, %128 : vector<16x64xf32>
    %130 = vector.extract_strided_slice %4 {offsets = [16, 32], sizes = [16, 16], strides = [1, 1]} : vector<32x192xf32> to vector<16x16xf32>
    %131 = vector.extract_strided_slice %4 {offsets = [16, 96], sizes = [16, 16], strides = [1, 1]} : vector<32x192xf32> to vector<16x16xf32>
    %132 = vector.extract_strided_slice %4 {offsets = [16, 160], sizes = [16, 16], strides = [1, 1]} : vector<32x192xf32> to vector<16x16xf32>
    %cst_47 = arith.constant dense<0.000000e+00> : vector<16x16xf32>
    %133 = tpu.matmul %130, %131, %cst_47 {dimension_numbers = #tpu.dot_dimension_numbers<[1], [1], [0], [0], [0, 0, 1, 0], [], []>} : vector<16x16xf32>, vector<16x16xf32>, vector<16x16xf32> -> vector<16x16xf32>
    %cst_48 = arith.constant 2.500000e-01 : f32
    %134 = vector.broadcast %cst_48 : f32 to vector<16x16xf32>
    %135 = arith.mulf %133, %134 : vector<16x16xf32>
    %cst_49 = arith.constant dense<0xFF800000> : vector<16xf32>
    %136 = vector.multi_reduction <maximumf>, %135, %cst_49 [1] : vector<16x16xf32> to vector<16xf32>
    %137 = vector.shape_cast %136 : vector<16xf32> to vector<16x1xf32>
    %138 = vector.broadcast %137 : vector<16x1xf32> to vector<16x16xf32>
    %139 = arith.subf %135, %138 : vector<16x16xf32>
    %140 = math.exp %139 : vector<16x16xf32>
    %cst_50 = arith.constant dense<0.000000e+00> : vector<16xf32>
    %141 = vector.multi_reduction <add>, %140, %cst_50 [1] : vector<16x16xf32> to vector<16xf32>
    %142 = vector.shape_cast %141 : vector<16xf32> to vector<16x1xf32>
    %143 = tpu.reciprocal %142 {approx = true} : vector<16x1xf32> -> vector<16x1xf32>
    %144 = vector.broadcast %143 : vector<16x1xf32> to vector<16x16xf32>
    %145 = arith.mulf %140, %144 : vector<16x16xf32>
    %cst_51 = arith.constant dense<0.000000e+00> : vector<16x16xf32>
    %146 = tpu.matmul %145, %132, %cst_51 {dimension_numbers = #tpu.dot_dimension_numbers<[1], [0], [0], [1], [0, 0, 1, 1], [], []>} : vector<16x16xf32>, vector<16x16xf32>, vector<16x16xf32> -> vector<16x16xf32>
    %147 = vector.extract_strided_slice %2 {offsets = [32, 0], sizes = [16, 64], strides = [1, 1]} : vector<64x64xf32> to vector<16x64xf32>
    %cst_52 = arith.constant dense<0.000000e+00> : vector<16x64xf32>
    %148 = tpu.matmul %146, %147, %cst_52 {dimension_numbers = #tpu.dot_dimension_numbers<[1], [0], [0], [1], [0, 0, 1, 1], [], []>} : vector<16x16xf32>, vector<16x64xf32>, vector<16x64xf32> -> vector<16x64xf32>
    %149 = arith.addf %129, %148 : vector<16x64xf32>
    %150 = vector.extract_strided_slice %4 {offsets = [16, 48], sizes = [16, 16], strides = [1, 1]} : vector<32x192xf32> to vector<16x16xf32>
    %151 = vector.extract_strided_slice %4 {offsets = [16, 112], sizes = [16, 16], strides = [1, 1]} : vector<32x192xf32> to vector<16x16xf32>
    %152 = vector.extract_strided_slice %4 {offsets = [16, 176], sizes = [16, 16], strides = [1, 1]} : vector<32x192xf32> to vector<16x16xf32>
    %cst_53 = arith.constant dense<0.000000e+00> : vector<16x16xf32>
    %153 = tpu.matmul %150, %151, %cst_53 {dimension_numbers = #tpu.dot_dimension_numbers<[1], [1], [0], [0], [0, 0, 1, 0], [], []>} : vector<16x16xf32>, vector<16x16xf32>, vector<16x16xf32> -> vector<16x16xf32>
    %cst_54 = arith.constant 2.500000e-01 : f32
    %154 = vector.broadcast %cst_54 : f32 to vector<16x16xf32>
    %155 = arith.mulf %153, %154 : vector<16x16xf32>
    %cst_55 = arith.constant dense<0xFF800000> : vector<16xf32>
    %156 = vector.multi_reduction <maximumf>, %155, %cst_55 [1] : vector<16x16xf32> to vector<16xf32>
    %157 = vector.shape_cast %156 : vector<16xf32> to vector<16x1xf32>
    %158 = vector.broadcast %157 : vector<16x1xf32> to vector<16x16xf32>
    %159 = arith.subf %155, %158 : vector<16x16xf32>
    %160 = math.exp %159 : vector<16x16xf32>
    %cst_56 = arith.constant dense<0.000000e+00> : vector<16xf32>
    %161 = vector.multi_reduction <add>, %160, %cst_56 [1] : vector<16x16xf32> to vector<16xf32>
    %162 = vector.shape_cast %161 : vector<16xf32> to vector<16x1xf32>
    %163 = tpu.reciprocal %162 {approx = true} : vector<16x1xf32> -> vector<16x1xf32>
    %164 = vector.broadcast %163 : vector<16x1xf32> to vector<16x16xf32>
    %165 = arith.mulf %160, %164 : vector<16x16xf32>
    %cst_57 = arith.constant dense<0.000000e+00> : vector<16x16xf32>
    %166 = tpu.matmul %165, %152, %cst_57 {dimension_numbers = #tpu.dot_dimension_numbers<[1], [0], [0], [1], [0, 0, 1, 1], [], []>} : vector<16x16xf32>, vector<16x16xf32>, vector<16x16xf32> -> vector<16x16xf32>
    %167 = vector.extract_strided_slice %2 {offsets = [48, 0], sizes = [16, 64], strides = [1, 1]} : vector<64x64xf32> to vector<16x64xf32>
    %cst_58 = arith.constant dense<0.000000e+00> : vector<16x64xf32>
    %168 = tpu.matmul %166, %167, %cst_58 {dimension_numbers = #tpu.dot_dimension_numbers<[1], [0], [0], [1], [0, 0, 1, 1], [], []>} : vector<16x16xf32>, vector<16x64xf32>, vector<16x64xf32> -> vector<16x64xf32>
    %169 = arith.addf %149, %168 : vector<16x64xf32>
    %170 = vector.broadcast %3 : vector<1x64xf32> to vector<16x64xf32>
    %171 = arith.addf %169, %170 : vector<16x64xf32>
    %c16 = arith.constant 16 : index
    %c0_59 = arith.constant 0 : index
    %172 = vector.load %arg5[%c16, %c0_59] : memref<32x64xf32, #tpu.memory_space<vmem>>, vector<16x64xf32>
    tpu.vector_store %arg5[%c16, %c0_59], %171 {strides = array<i32>} : memref<32x64xf32, #tpu.memory_space<vmem>>, vector<16x64xf32>,
    return
  }
  func.func @transform_0(%arg0: i32) -> (i32, i32) {
    %c0_i32 = arith.constant 0 : i32
    %c0_i32_0 = arith.constant 0 : i32
    %c0_i32_1 = arith.constant 0 : i32
    return %c0_i32, %c0_i32_0 : i32, i32
  }
  func.func @transform_1(%arg0: i32) -> (i32, i32) {
    %c0_i32 = arith.constant 0 : i32
    %c0_i32_0 = arith.constant 0 : i32
    %c0_i32_1 = arith.constant 0 : i32
    return %c0_i32, %c0_i32_0 : i32, i32
  }
  func.func @transform_2(%arg0: i32) -> (i32, i32) {
    %c0_i32 = arith.constant 0 : i32
    %c0_i32_0 = arith.constant 0 : i32
    %c0_i32_1 = arith.constant 0 : i32
    return %c0_i32, %c0_i32_0 : i32, i32
  }
  func.func @transform_3(%arg0: i32) -> (i32, i32) {
    %c0_i32 = arith.constant 0 : i32
    %c0_i32_0 = arith.constant 0 : i32
    %c0_i32_1 = arith.constant 0 : i32
    return %c0_i32, %c0_i32_0 : i32, i32
  }
  func.func @transform_4(%arg0: i32) -> (i32, i32) {
    %c0_i32 = arith.constant 0 : i32
    %c0_i32_0 = arith.constant 0 : i32
    %c0_i32_1 = arith.constant 0 : i32
    return %c0_i32, %c0_i32_0 : i32, i32
  }
}

</mosaic_0001>

<bundles_post_ra>
// kernel: attention_forward.1
= control target key start
LH: loop header
LB: loop body
LE: loop exit
PB: predicated region body
PF: predicated region fallthrough
CT: control target
= control target key end

     0   :  { %9 = vsyncpa [#allocation3], 0  ;;  %s1816_s0 = inlined_call_operand.hbm [shape: f32[32,64], index: 0, kind: input, shape index: {}]   ;;  %s1817_s1 = inlined_call_operand.hbm [shape: f32[64,192], index: 1, kind: input, shape index: {}]   ;;  %s1818_s2 = inlined_call_operand.hbm [shape: f32[64,64], index: 2, kind: input, shape index: {}]   ;;  %s1819_s3 = inlined_call_operand.vmem [shape: f32[1,64], index: 3, kind: input, shape index: {}]   ;;  %s1820_s4 = inlined_call_operand.hbm [shape: f32[32,64], index: 4, kind: output, shape index: {}]  }
   0x1   :  { %10 = vsyncpa [#allocation6], 0  ;;  %s29_s17 = sshll.u32 %s1817_s1, 4  ;;  %s30_s17 = int_to_ptr.hbm [resolvable:$true] %s29_s17 }
   0x2   :  { %11 = vsyncpa [#allocation4], 0  ;;  %s1494_s18 = smov [#allocation5]   ;;  %s16_s22 = sshll.u32 %s1816_s0, 4  ;;  %s17_s22 = int_to_ptr.hbm [resolvable:$true] %s16_s22 }
   0x3   :  { %s31_s19 = sshll.u32 %s1494_s18, 4  ;;  %s1495_s23 = smov 256   ;;  %s32_s19 = int_to_ptr.vmem [resolvable:$true] %s31_s19 }
   0x4   :  { %s1496_s24 = smov 16   ;;  %s1497_s25 = smov [#allocation2]  }
   0x5   :  { %37 = dma.hbm_to_vmem [thread:$0]  %s30_s17, 2048, %s32_s19, [#allocation6], %s1495_s23, %s1495_s23, %s1496_s24  }
   0x6   :  { %s18_s26 = sshll.u32 %s1497_s25, 4  ;;  %s1498_s27 = smov 128   ;;  %s19_s26 = int_to_ptr.vmem [resolvable:$true] %s18_s26 }
   0x7   :  { %s1499_s28 = smov 8   ;;  %s42_s30 = sshll.u32 %s1818_s2, 4  ;;  %s43_s30 = int_to_ptr.hbm [resolvable:$true] %s42_s30 }
   0x8   :  { %24 = dma.hbm_to_vmem [thread:$0]  %s17_s22, 512, %s19_s26, [#allocation3], %s1498_s27, %s1498_s27, %s1499_s28  }
   0x9   :  { %s1500_s0 = smov [#allocation7]  }
   0xa   :  { %s44_s5 = sshll.u32 %s1500_s0, 4  ;;  %s45_s5 = int_to_ptr.vmem [resolvable:$true] %s44_s5 }
   0xb   :  { %50 = dma.hbm_to_vmem [thread:$0]  %s43_s30, 1024, %s45_s5, [#allocation6], %s1498_s27, %s1498_s27, %s1499_s28  }
   0xc   :  { %1488 = dma.done.wait [#allocation3], 512  }
   0xd   :  { %1489 = vsyncadd [#allocation3], 4294966784 }
   0xe   :  { %1490 = dma.done.wait [#allocation6], 3072  }
   0xf   :  { %1491 = vsyncadd [#allocation6], 4294964224  ;;  %v83_v0 = vld [vmem:[#allocation5 + $0x70] sm:$0xff]  ;;  %v81_v1 = vld [vmem:[#allocation5 + $0x60] sm:$0xff]  ;;  %vm94_vm0 = vcmask 523264   ;;  %s1501_s2 = smov 64  }
  0x10   :  { %115 = vmatpush.msra.mxu0 %v83_v0  ;;  %v79_v2 = vld [vmem:[#allocation5 + $0x50] sm:$0xff]  ;;  %v84_v3 = vld [vmem:[#allocation5 + $0x78] sm:$0xff]  ;;  %v82_v4 = vld [vmem:[#allocation5 + $0x68] sm:$0xff]  ;;  %s1502_s6 = smov 48   ;;  %s1503_s7 = smov 112   ;;  %vm171_vm1 = vcmask 130048  }
  0x11   :  { %v77_v5 = vld [vmem:[#allocation5 + $0x40] sm:$0xff]  ;;  %144 = vmatpush.msra.mxu1 %v84_v3  ;;  %v80_v6 = vld [vmem:[#allocation5 + $0x58] sm:$0xff]  ;;  %v75_v7 = vld [vmem:[#allocation5 + $0x30] sm:$0xff]  ;;  %s1504_s8 = smov 96   ;;  %s1505_s9 = smov 32  }
  0x12   :  { %116 = vmatpush.msra.mxu0 %v81_v1  ;;  %v78_v8 = vld [vmem:[#allocation5 + $0x48] sm:$0xff]  ;;  %v73_v9 = vld [vmem:[#allocation5 + $0x20] sm:$0xff]  ;;  %v76_v10 = vld [vmem:[#allocation5 + $0x38] sm:$0xff]  ;;  %s1506_s10 = smov 80   ;;  %s1195_s16 = sshll.u32 %s1820_s4, 4  ;;  %s1196_s16 = int_to_ptr.hbm [resolvable:$true] %s1195_s16 }
  0x13   :  { %145 = vmatpush.msra.mxu1 %v82_v4  ;;  %v71_v11 = vld [vmem:[#allocation5 + $0x10] sm:$0xff]  ;;  %v74_v12 = vld [vmem:[#allocation5 + $0x28] sm:$0xff]  ;;  %v69_v13 = vld [vmem:[#allocation5] sm:$0xff] }
  0x14   :  { %117 = vmatpush.msra.mxu0 %v79_v2  ;;  %v65_v14 = vld [vmem:[#allocation2] sm:$0xff]  ;;  %v66_v15 = vld [vmem:[#allocation2 + $0x8] sm:$0xff]  ;;  %v72_v16 = vld [vmem:[#allocation5 + $0x18] sm:$0xff] }
  0x15   :  { %146 = vmatpush.msra.mxu1 %v80_v6  ;;  %v70_v17 = vld [vmem:[#allocation5 + $0x8] sm:$0xff] }
  0x16   :  { %118 = vmatpush.msra.mxu0 %v77_v5 }
  0x17   :  { %147 = vmatpush.msra.mxu1 %v78_v8  ;;  %v67_v8 = vld [vmem:[#allocation2 + $0x10] sm:$0xff] }
  0x18   :  { %119 = vmatpush.msra.mxu0 %v75_v7 }
  0x19   :  { %148 = vmatpush.msra.mxu1 %v76_v10  ;;  %v1613_v10 = vld [vmem:[#allocation7 + $0x8] sm:$0xff] }
  0x1a   :  { %120 = vmatpush.msra.mxu0 %v73_v9  ;;  %v1611_v9 = vld [vmem:[#allocation7 + $0x18] sm:$0xff] }
  0x1b   :  { %149 = vmatpush.msra.mxu1 %v74_v12  ;;  %v1617_v12 = vld [vmem:[#allocation7 + $0x10] sm:$0xff] }
  0x1c   :  { %121 = vmatpush.msra.mxu0 %v71_v11  ;;  %v68_v11 = vld [vmem:[#allocation2 + $0x18] sm:$0xff] }
  0x1d   :  { %150 = vmatpush.msra.mxu1 %v72_v16 }
  0x1e   :  { %122 = vmatpush.msra.mxu0 %v69_v13  ;;  %v1622_v13 = vld [vmem:[#allocation7] sm:$0xff] }
  0x1f   :  { %1209 = vmatmul.msk.f32.vlgmr.msra.gmra.mxu0 %vm94_vm0, %v65_v14  ;;  %151 = vmatpush.msra.mxu1 %v70_v17 }
  0x20   :  { %1213 = vmatmul.msk.f32.vlgmr.msra.gmra.mxu1 %vm94_vm0, %v65_v14 }
  0x27   :  { %1210 = vmatmul.msk.f32.gmra.mxu0 %vm94_vm0, %v66_v15 }
  0x28   :  { %1214 = vmatmul.msk.f32.gmra.mxu1 %vm94_vm0, %v66_v15 }
  0x2f   :  { %1211 = vmatmul.msk.f32.gmra.mxu0 %vm94_vm0, %v67_v8 }
  0x30   :  { %1215 = vmatmul.msk.f32.gmra.mxu1 %vm94_vm0, %v67_v8 }
  0x37   :  { %1212 = vmatmul.msk.f32.gmra.mxu0 %vm94_vm0, %v68_v11 }
  0x38   :  { %1216 = vmatmul.msk.f32.gmra.mxu1 %vm94_vm0, %v68_v11 }
  0x9c   :  { %v1553_v18 = vpop.f32.mrf.mxu0 }
  0x9d   :  { %v1565_v20 = vpop.f32.mrf.mxu1 }
  0xa4   :  { %v1555_v19 = vpop.f32.mrf.mxu0 }
  0xa5   :  { %169 = vrot.lane.b32.xlu0 %v1555_v19, %s1501_s2  ;;  %v156_v21 = vpop.f32.mrf.mxu1 }
  0xa6   :  { %247 = vmatpush.msra.mxu3 %v156_v21  ;;  %v1595_v58 = vpack.i.bf16 %v1565_v20, %v156_v21 }
  0xa8   :  { %248 = vmatpush.msra.mxu3 %v1565_v20 }
  0xad   :  { %167 = vrot.lane.b32.xlu0 %v1553_v18, %s1501_s2 }
  0xb5   :  { %262 = vrot.lane.b32.xlu0 %v1555_v19, %s1502_s6 }
  0xbd   :  { %258 = vrot.lane.b32.xlu0 %v1555_v19, %s1503_s7 }
 0x117   :  { %v170_v22 = vpop.permute.xlu0 %169 }
 0x118   :  { %1217 = vmatpush.xpose.msk.msra.mxu2 %vm171_vm1, %v170_v22 }
 0x11f   :  { %v168_v23 = vpop.permute.xlu0 %167 }
 0x120   :  { %1218 = vmatpush.xpose.msk.msra.mxu2 %vm171_vm1, %v168_v23 }
 0x123   :  { %1219 = vmatmul.msk.f32.vlgmr.msra.gmra.mxu2 %vm171_vm1, %v1553_v18 }
 0x127   :  { %v263_v24 = vpop.permute.xlu0 %262 }
 0x128   :  { %1223 = vmatpush.xpose.msk.msrb.mxu3 %vm171_vm1, %v263_v24 }
 0x12b   :  { %1220 = vmatmul.msk.f32.gmra.mxu2 %vm171_vm1, %v1555_v19 }
 0x12f   :  { %v259_v49 = vpop.permute.xlu0 %258 }
 0x1a6   :  { %v197_v25 = vpop.f32.mrf.mxu2 }
 0x1a7   :  { %v203_v26 = vmul.f32 0.25, %v197_v25  ;;  %v1636_v25 = vpop.f32.mrf.mxu0 }
 0x1a9   :  { %v205_v27 = vsel %vm171_vm1, %v203_v26, -inf }
 0x1aa   :  { %206 = vmax.xlane.f32.xlu1 %v205_v27 }
 0x1ae   :  { %v200_v28 = vpop.f32.mrf.mxu2 }
 0x1af   :  { %v204_v29 = vmul.f32 0.25, %v200_v28  ;;  %v1639_v27 = vpop.f32.mrf.mxu0 }
 0x1b1   :  { %v208_v30 = vsel %vm171_vm1, %v204_v29, -inf }
 0x1b2   :  { %209 = vmax.xlane.f32.xlu1 %v208_v30 }
 0x1cb   :  { %260 = vrot.lane.b32.xlu1 %v1553_v18, %s1502_s6 }
 0x21d   :  { %v207_v31 = vpop.xlane.xlu1 %206 }
 0x21e   :  { %v211_v32 = vsub.f32 %v203_v26, %v207_v31 }
 0x220   :  { %v213_v33 = vmul.f32 1.442695, %v211_v32 }
 0x222   :  { %1328 = vpow2.f32 %v213_v33 }
 0x225   :  { %v210_v34 = vpop.xlane.xlu1 %209 }
 0x226   :  { %v212_v35 = vsub.f32 %v204_v29, %v210_v34 }
 0x228   :  { %v1329_v36 = vpop.eup %1328  ;;  %v215_v37 = vmul.f32 1.442695, %v212_v35 }
 0x229   :  { %v217_v38 = vsel %vm171_vm1, %v1329_v36, 0.0 }
 0x22a   :  { %1330 = vpow2.f32 %v215_v37  ;;  %218 = vadd.xlane.f32.xlu2 %v217_v38 }
 0x230   :  { %v1331_v39 = vpop.eup %1330 }
 0x231   :  { %v220_v40 = vsel %vm171_vm1, %v1331_v39, 0.0 }
 0x232   :  { %221 = vadd.xlane.f32.xlu2 %v220_v40 }
 0x23d   :  { %v261_v41 = vpop.permute.xlu1 %260 }
 0x23e   :  { %1224 = vmatpush.xpose.msk.msrb.mxu3 %vm171_vm1, %v261_v41 }
 0x24a   :  { %256 = vrot.lane.b32.xlu2 %v1553_v18, %s1503_s7 }
 0x29d   :  { %v219_v42 = vpop.xlane.xlu2 %218 }
 0x29e   :  { %1332 = vrcp.f32 %v219_v42 }
 0x2a4   :  { %v1333_v43 = vpop.eup %1332 }
 0x2a5   :  { %v222_v44 = vpop.xlane.xlu2 %221  ;;  %v225_v45 = vmul.f32 %v1333_v43, %v1329_v36 }
 0x2a6   :  { %1334 = vrcp.f32 %v222_v44 }
 0x2a7   :  { %1221 = vmatmul.msk.f32.vlgmr.msra.gmra.mxu3 %vm171_vm1, %v225_v45 }
 0x2a8   :  { %376 = vmatpush.msra.mxu3 %v1611_v9 }
 0x2aa   :  { %377 = vmatpush.msra.mxu3 %v1617_v12 }
 0x2ac   :  { %v1335_v46 = vpop.eup %1334 }
 0x2ad   :  { %v226_v47 = vmul.f32 %v1335_v46, %v1331_v39  ;;  %v257_v48 = vpop.permute.xlu2 %256  ;;  %v90_v46 = vld [vmem:[#allocation7 + $0x28] sm:$0xff] }
 0x2af   :  { %1222 = vmatmul.msk.f32.gmra.mxu3 %vm171_vm1, %v226_v47  ;;  %v89_v47 = vld [vmem:[#allocation7 + $0x20] sm:$0xff] }
 0x2b7   :  { %1225 = vmatmul.msk.f32.vlgmr.msrb.gmra.mxu3 %vm171_vm1, %v257_v48 }
 0x2bf   :  { %1226 = vmatmul.msk.f32.gmra.mxu3 %vm171_vm1, %v259_v49 }
 0x32a   :  { %v1588_v50 = vpop.f32.mrf.mxu3 }
 0x332   :  { %v1590_v51 = vpop.f32.mrf.mxu3 }
 0x33a   :  { %v289_v52 = vpop.f32.mrf.mxu3 }
 0x33b   :  { %v295_v53 = vmul.f32 0.25, %v289_v52 }
 0x33d   :  { %v297_v54 = vsel %vm171_vm1, %v295_v53, -inf }
 0x33e   :  { %298 = vmax.xlane.f32.xlu0 %v297_v54 }
 0x342   :  { %v292_v55 = vpop.f32.mrf.mxu3 }
 0x343   :  { %v296_v56 = vmul.f32 0.25, %v292_v55  ;;  %v1663_v55 = vpop.f32.mrf.mxu1 }
 0x345   :  { %v300_v57 = vsel %vm171_vm1, %v296_v56, -inf }
 0x346   :  { %301 = vmax.xlane.f32.xlu2 %v300_v57 }
 0x352   :  { %1298 = vrot.lane.b32.xlu0 %v1595_v58, %s1503_s7 }
 0x35a   :  { %414 = vrot.lane.b32.xlu0 %v1553_v18, %s1504_s8 }
 0x362   :  { %416 = vrot.lane.b32.xlu0 %v1555_v19, %s1504_s8 }
 0x3b1   :  { %v299_v59 = vpop.xlane.xlu0 %298 }
 0x3b2   :  { %v303_v60 = vsub.f32 %v295_v53, %v299_v59 }
 0x3b4   :  { %v305_v61 = vmul.f32 1.442695, %v303_v60  ;;  %v1667_v60 = vpop.f32.mrf.mxu1 }
 0x3b6   :  { %1336 = vpow2.f32 %v305_v61 }
 0x3b9   :  { %v302_v62 = vpop.xlane.xlu2 %301 }
 0x3ba   :  { %v304_v63 = vsub.f32 %v296_v56, %v302_v62 }
 0x3bc   :  { %v1337_v0 = vpop.eup %1336  ;;  %v307_v1 = vmul.f32 1.442695, %v304_v63 }
 0x3bd   :  { %v309_v2 = vsel %vm171_vm1, %v1337_v0, 0.0 }
 0x3be   :  { %1338 = vpow2.f32 %v307_v1  ;;  %310 = vadd.xlane.f32.xlu1 %v309_v2 }
 0x3c4   :  { %v1339_v3 = vpop.eup %1338  ;;  %v1299_v4 = vpop.permute.xlu0 %1298 }
 0x3c5   :  { %v312_v5 = vsel %vm171_vm1, %v1339_v3, 0.0  ;;  %v1300_v6 = vunpack.i.l.bf16 %v1299_v4  ;;  %v1301_v7 = vunpack.i.h.bf16 %v1299_v4 }
 0x3c6   :  { %313 = vadd.xlane.f32.xlu2 %v312_v5 }
 0x3c7   :  { %347 = vmatpush.msrb.mxu2 %v1300_v6 }
 0x3c9   :  { %348 = vmatpush.msrb.mxu2 %v1301_v7 }
 0x3cb   :  { %405 = vmatpush.msra.mxu2 %v1613_v10 }
 0x3cc   :  { %v415_v24 = vpop.permute.xlu0 %414 }
 0x3cd   :  { %406 = vmatpush.msra.mxu2 %v1622_v13 }
 0x3d4   :  { %v417_v29 = vpop.permute.xlu0 %416 }
 0x3d7   :  { %420 = vrot.lane.b32.xlu1 %v1555_v19, %s1505_s9 }
 0x3de   :  { %418 = vrot.lane.b32.xlu2 %v1553_v18, %s1505_s9 }
 0x431   :  { %v311_v14 = vpop.xlane.xlu1 %310 }
 0x432   :  { %1340 = vrcp.f32 %v311_v14 }
 0x438   :  { %v1341_v15 = vpop.eup %1340 }
 0x439   :  { %v314_v16 = vpop.xlane.xlu2 %313  ;;  %v317_v17 = vmul.f32 %v1341_v15, %v1337_v0 }
 0x43a   :  { %1342 = vrcp.f32 %v314_v16 }
 0x43b   :  { %1227 = vmatmul.msk.f32.vlgmr.msrb.gmra.mxu2 %vm171_vm1, %v317_v17 }
 0x440   :  { %v1343_v20 = vpop.eup %1342 }
 0x441   :  { %v318_v21 = vmul.f32 %v1343_v20, %v1339_v3  ;;  %v419_v23 = vpop.permute.xlu2 %418 }
 0x443   :  { %1228 = vmatmul.msk.f32.gmra.mxu2 %vm171_vm1, %v318_v21 }
 0x449   :  { %v421_v22 = vpop.permute.xlu1 %420 }
 0x44a   :  { %1233 = vmatpush.xpose.msk.msrb.mxu0 %vm171_vm1, %v421_v22  ;;  %1281 = vmatpush.xpose.msk.msrb.mxu3 %vm171_vm1, %v421_v22 }
 0x44b   :  { %1231 = vmatmul.msk.f32.vlgmr.msra.gmra.mxu2 %vm171_vm1, %v1588_v50 }
 0x44e   :  { %1234 = vmatpush.xpose.msk.msrb.mxu0 %vm171_vm1, %v419_v23  ;;  %1282 = vmatpush.xpose.msk.msrb.mxu3 %vm171_vm1, %v419_v23 }
 0x451   :  { %1235 = vmatmul.msk.f32.vlgmr.msrb.gmra.mxu0 %vm171_vm1, %v415_v24 }
 0x453   :  { %1232 = vmatmul.msk.f32.gmra.mxu2 %vm171_vm1, %v1590_v51 }
 0x4be   :  { %v350_v26 = vpop.f32.mrf.mxu2 }
 0x4bf   :  { %1229 = vmatmul.msk.f32.vlgmr.msra.gmra.mxu3 %vm171_vm1, %v350_v26 }
 0x4c0   :  { %532 = vmatpush.msra.mxu3 %v90_v46 }
 0x4c2   :  { %533 = vmatpush.msra.mxu3 %v89_v47 }
 0x4c6   :  { %v353_v28 = vpop.f32.mrf.mxu2 }
 0x4c7   :  { %1230 = vmatmul.msk.f32.gmra.mxu3 %vm171_vm1, %v353_v28 }
 0x4ce   :  { %v447_v30 = vpop.f32.mrf.mxu0  ;;  %v1689_v4 = vpop.f32.mrf.mxu2 }
 0x4cf   :  { %v453_v31 = vmul.f32 0.25, %v447_v30  ;;  %1236 = vmatmul.msk.f32.vlgmr.msrb.gmra.mxu3 %vm171_vm1, %v417_v29 }
 0x4d1   :  { %v455_v32 = vsel %vm171_vm1, %v453_v31, -inf }
 0x4d2   :  { %456 = vmax.xlane.f32.xlu1 %v455_v32 }
 0x4d6   :  { %v411_v6 = vpop.f32.mrf.mxu2 }
 0x4eb   :  { %1303 = vrot.lane.b32.xlu1 %v1595_v58, %s1504_s8 }
 0x4f3   :  { %549 = vrot.lane.b32.xlu1 %v1555_v19, %s1496_s24 }
 0x4fb   :  { %545 = vrot.lane.b32.xlu1 %v1555_v19, %s1506_s10 }
 0x542   :  { %v1650_v33 = vpop.f32.mrf.mxu3 }
 0x545   :  { %v457_v34 = vpop.xlane.xlu1 %456 }
 0x546   :  { %v461_v35 = vsub.f32 %v453_v31, %v457_v34 }
 0x548   :  { %v463_v36 = vmul.f32 1.442695, %v461_v35 }
 0x54a   :  { %1344 = vpow2.f32 %v463_v36  ;;  %v1652_v37 = vpop.f32.mrf.mxu3 }
 0x54b   :  { %v412_v7 = vadd.f32 %v411_v6, %v1652_v37 }
 0x550   :  { %v1345_v38 = vpop.eup %1344 }
 0x551   :  { %v467_v39 = vsel %vm171_vm1, %v1345_v38, 0.0 }
 0x552   :  { %v450_v40 = vpop.f32.mrf.mxu3  ;;  %468 = vadd.xlane.f32.xlu2 %v467_v39 }
 0x553   :  { %v454_v41 = vmul.f32 0.25, %v450_v40 }
 0x555   :  { %v458_v42 = vsel %vm171_vm1, %v454_v41, -inf }
 0x556   :  { %459 = vmax.xlane.f32.xlu0 %v458_v42 }
 0x55d   :  { %v1304_v43 = vpop.permute.xlu1 %1303 }
 0x55e   :  { %v1305_v44 = vunpack.i.l.bf16 %v1304_v43  ;;  %v1306_v19 = vunpack.i.h.bf16 %v1304_v43 }
 0x560   :  { %503 = vmatpush.msrb.mxu1 %v1305_v44 }
 0x562   :  { %504 = vmatpush.msrb.mxu1 %v1306_v19 }
 0x565   :  { %v550_v45 = vpop.permute.xlu1 %549 }
 0x566   :  { %1241 = vmatpush.xpose.msk.msrb.mxu2 %vm171_vm1, %v550_v45 }
 0x56a   :  { %683 = vrot.lane.b32.xlu2 %v1639_v27, %s1501_s2 }
 0x572   :  { %547 = vrot.lane.b32.xlu2 %v1553_v18, %s1496_s24 }
 0x5c5   :  { %v469_v48 = vpop.xlane.xlu2 %468 }
 0x5c6   :  { %1346 = vrcp.f32 %v469_v48 }
 0x5c9   :  { %v460_v49 = vpop.xlane.xlu0 %459 }
 0x5ca   :  { %v462_v50 = vsub.f32 %v454_v41, %v460_v49 }
 0x5cc   :  { %v1347_v51 = vpop.eup %1346  ;;  %v465_v52 = vmul.f32 1.442695, %v462_v50 }
 0x5cd   :  { %v684_v53 = vpop.permute.xlu2 %683  ;;  %v475_v54 = vmul.f32 %v1347_v51, %v1345_v38 }
 0x5ce   :  { %1348 = vpow2.f32 %v465_v52  ;;  %1249 = vmatpush.xpose.msk.msrb.mxu3 %vm171_vm1, %v684_v53 }
 0x5cf   :  { %1237 = vmatmul.msk.f32.vlgmr.msrb.gmra.mxu1 %vm171_vm1, %v475_v54 }
 0x5d4   :  { %v1349_v56 = vpop.eup %1348 }
 0x5d5   :  { %v548_v57 = vpop.permute.xlu2 %547  ;;  %v470_v59 = vsel %vm171_vm1, %v1349_v56, 0.0 }
 0x5d6   :  { %471 = vadd.xlane.f32.xlu0 %v470_v59  ;;  %1242 = vmatpush.xpose.msk.msrb.mxu2 %vm171_vm1, %v548_v57 }
 0x5da   :  { %760 = vmatpush.msra.mxu2 %v1667_v60 }
 0x5dc   :  { %761 = vmatpush.msra.mxu2 %v1663_v55 }
 0x5ea   :  { %681 = vrot.lane.b32.xlu0 %v1636_v25, %s1501_s2 }
 0x5f2   :  { %543 = vrot.lane.b32.xlu0 %v1553_v18, %s1506_s10  ;;  %v546_v18 = vpop.permute.xlu1 %545 }
 0x649   :  { %v472_v61 = vpop.xlane.xlu0 %471 }
 0x64a   :  { %1350 = vrcp.f32 %v472_v61 }
 0x64c   :  { %v506_v62 = vpop.f32.mrf.mxu1 }
 0x64d   :  { %1239 = vmatmul.msk.f32.vlgmr.msra.gmra.mxu3 %vm171_vm1, %v506_v62 }
 0x650   :  { %v1351_v63 = vpop.eup %1350 }
 0x651   :  { %v476_v0 = vmul.f32 %v1351_v63, %v1349_v56 }
 0x653   :  { %1238 = vmatmul.msk.f32.gmra.mxu1 %vm171_vm1, %v476_v0 }
 0x65c   :  { %v682_v1 = vpop.permute.xlu0 %681 }
 0x65d   :  { %1250 = vmatpush.xpose.msk.msrb.mxu3 %vm171_vm1, %v682_v1  ;;  %v1736_v1 = vld [vmem:[#allocation7 + $0x38] sm:$0xff] }
 0x65e   :  { %661 = vmatpush.msra.mxu1 %v1736_v1 }
 0x661   :  { %889 = vmatpush.msra.mxu3 %v1611_v9 }
 0x663   :  { %890 = vmatpush.msra.mxu3 %v1617_v12 }
 0x664   :  { %v544_v2 = vpop.permute.xlu0 %543 }
 0x665   :  { %1243 = vmatmul.msk.f32.vlgmr.msrb.gmra.mxu2 %vm171_vm1, %v544_v2  ;;  %v1739_v2 = vld [vmem:[#allocation7 + $0x30] sm:$0xff] }
 0x666   :  { %918 = vmatpush.msrb.mxu2 %v1613_v10  ;;  %662 = vmatpush.msra.mxu1 %v1739_v2 }
 0x668   :  { %919 = vmatpush.msrb.mxu2 %v1622_v13 }
 0x66d   :  { %1244 = vmatmul.msk.f32.gmra.mxu2 %vm171_vm1, %v546_v18 }
 0x6d0   :  { %v509_v3 = vpop.f32.mrf.mxu1  ;;  %v1691_v5 = vpop.f32.mrf.mxu3 }
 0x6d1   :  { %1240 = vmatmul.msk.f32.gmra.mxu3 %vm171_vm1, %v509_v3 }
 0x6d9   :  { %1251 = vmatmul.msk.f32.vlgmr.msrb.gmra.mxu3 %vm171_vm1, %v1636_v25 }
 0x6da   :  { %1045 = vmatpush.msrb.mxu3 %v90_v46 }
 0x6dc   :  { %1046 = vmatpush.msrb.mxu3 %v89_v47 }
 0x6e1   :  { %1252 = vmatmul.msk.f32.gmra.mxu3 %vm171_vm1, %v1639_v27 }
 0x6e8   :  { %v576_v16 = vpop.f32.mrf.mxu2 }
 0x6e9   :  { %v582_v17 = vmul.f32 0.25, %v576_v16 }
 0x6eb   :  { %v584_v20 = vsel %vm171_vm1, %v582_v17, -inf }
 0x6f0   :  { %v579_v30 = vpop.f32.mrf.mxu2 }
 0x6f1   :  { %v583_v31 = vmul.f32 0.25, %v579_v30 }
 0x6f3   :  { %v587_v37 = vsel %vm171_vm1, %v583_v31, -inf }
 0x754   :  { %v538_v8 = vpop.f32.mrf.mxu3 }
 0x755   :  { %v1694_v9 = vadd.f32 %v538_v8, %v412_v7 }
 0x75c   :  { %v710_v10 = vpop.f32.mrf.mxu3 }
 0x75d   :  { %v716_v11 = vmul.f32 0.25, %v710_v10 }
 0x75f   :  { %v718_v12 = vsel %vm171_vm1, %v716_v11, -inf }
 0x760   :  { %719 = vmax.xlane.f32.xlu2 %v718_v12 }
 0x764   :  { %v713_v13 = vpop.f32.mrf.mxu3 }
 0x765   :  { %v717_v14 = vmul.f32 0.25, %v713_v13 }
 0x767   :  { %v721_v15 = vsel %vm171_vm1, %v717_v14, -inf }
 0x768   :  { %722 = vmax.xlane.f32.xlu0 %v721_v15 }
 0x770   :  { %585 = vmax.xlane.f32.xlu0 %v584_v20 }
 0x784   :  { %1308 = vrot.lane.b32.xlu0 %v1595_v58, %s1506_s10 }
 0x78c   :  { %769 = vrot.lane.b32.xlu0 %v1636_v25, %s1503_s7 }
 0x794   :  { %771 = vrot.lane.b32.xlu0 %v1639_v27, %s1503_s7 }
 0x79c   :  { %1062 = vrot.lane.b32.xlu0 %v1639_v27, %s1496_s24 }
 0x7a4   :  { %927 = vrot.lane.b32.xlu0 %v1636_v25, %s1504_s8 }
 0x7ac   :  { %1058 = vrot.lane.b32.xlu0 %v1639_v27, %s1506_s10 }
 0x7d3   :  { %v720_v21 = vpop.xlane.xlu2 %719 }
 0x7d4   :  { %v724_v22 = vsub.f32 %v716_v11, %v720_v21  ;;  %v1762_v21 = vld [vmem:[%s1819_s3] ss:$0 sm:$0xff]  ;;  %s1507_s3 = smov [#allocation8]  }
 0x7d5   :  { %s1193_s13 = sshll.u32 %s1507_s3, 4  ;;  %s1194_s13 = int_to_ptr.vmem [resolvable:$true] %s1193_s13 }
 0x7d6   :  { %v726_v23 = vmul.f32 1.442695, %v724_v22 }
 0x7d8   :  { %1352 = vpow2.f32 %v726_v23 }
 0x7db   :  { %v723_v58 = vpop.xlane.xlu0 %722 }
 0x7dc   :  { %v725_v24 = vsub.f32 %v717_v14, %v723_v58 }
 0x7de   :  { %v1353_v26 = vpop.eup %1352  ;;  %v728_v28 = vmul.f32 1.442695, %v725_v24 }
 0x7df   :  { %v730_v29 = vsel %vm171_vm1, %v1353_v26, 0.0 }
 0x7e0   :  { %1354 = vpow2.f32 %v728_v28  ;;  %731 = vadd.xlane.f32.xlu1 %v730_v29 }
 0x7e3   :  { %v586_v32 = vpop.xlane.xlu0 %585 }
 0x7e4   :  { %v590_v34 = vsub.f32 %v582_v17, %v586_v32  ;;  %v409_v17 = vadd.f32 %v1689_v4, %v1650_v33 }
 0x7e6   :  { %v1355_v35 = vpop.eup %1354  ;;  %v592_v36 = vmul.f32 1.442695, %v590_v34  ;;  %v541_v20 = vadd.f32 %v1691_v5, %v409_v17 }
 0x7e7   :  { %v733_v38 = vsel %vm171_vm1, %v1355_v35, 0.0 }
 0x7e8   :  { %1356 = vpow2.f32 %v592_v36  ;;  %588 = vmax.xlane.f32.xlu1 %v587_v37  ;;  %734 = vadd.xlane.f32.xlu2 %v733_v38 }
 0x7ee   :  { %v1357_v39 = vpop.eup %1356 }
 0x7ef   :  { %v596_v40 = vsel %vm171_vm1, %v1357_v39, 0.0 }
 0x7f0   :  { %597 = vadd.xlane.f32.xlu2 %v596_v40 }
 0x7f6   :  { %v1309_v41 = vpop.permute.xlu0 %1308 }
 0x7f7   :  { %v1310_v42 = vunpack.i.l.bf16 %v1309_v41  ;;  %v1311_v43 = vunpack.i.h.bf16 %v1309_v41 }
 0x7f9   :  { %632 = vmatpush.msra.mxu0 %v1310_v42 }
 0x7fb   :  { %633 = vmatpush.msra.mxu0 %v1311_v43 }
 0x7fe   :  { %v770_v44 = vpop.permute.xlu0 %769 }
 0x806   :  { %v772_v19 = vpop.permute.xlu0 %771 }
 0x808   :  { %775 = vrot.lane.b32.xlu2 %v1639_v27, %s1502_s6 }
 0x80e   :  { %v1063_v51 = vpop.permute.xlu0 %1062 }
 0x810   :  { %933 = vrot.lane.b32.xlu2 %v1639_v27, %s1505_s9 }
 0x816   :  { %v928_v12 = vpop.permute.xlu0 %927 }
 0x818   :  { %1060 = vrot.lane.b32.xlu2 %v1636_v25, %s1496_s24 }
 0x81e   :  { %v1059_v14 = vpop.permute.xlu0 %1058 }
 0x820   :  { %929 = vrot.lane.b32.xlu2 %v1639_v27, %s1504_s8 }
 0x853   :  { %v732_v45 = vpop.xlane.xlu1 %731 }
 0x854   :  { %1358 = vrcp.f32 %v732_v45 }
 0x85a   :  { %v1359_v46 = vpop.eup %1358 }
 0x85b   :  { %v738_v47 = vmul.f32 %v1359_v46, %v1353_v26  ;;  %v589_v48 = vpop.xlane.xlu1 %588  ;;  %v735_v49 = vpop.xlane.xlu2 %734 }
 0x85c   :  { %v591_v50 = vsub.f32 %v583_v31, %v589_v48  ;;  %1360 = vrcp.f32 %v735_v49 }
 0x85d   :  { %1253 = vmatmul.msk.f32.vlgmr.msra.gmra.mxu2 %vm171_vm1, %v738_v47 }
 0x85e   :  { %v594_v52 = vmul.f32 1.442695, %v591_v50  ;;  %1273 = vmatpush.xpose.msk.msra.mxu2 %vm171_vm1, %v1063_v51 }
 0x860   :  { %1362 = vpow2.f32 %v594_v52 }
 0x862   :  { %v1361_v53 = vpop.eup %1360 }
 0x863   :  { %v598_v54 = vpop.xlane.xlu2 %597  ;;  %v739_v27 = vmul.f32 %v1361_v53, %v1355_v35 }
 0x864   :  { %1364 = vrcp.f32 %v598_v54 }
 0x865   :  { %1254 = vmatmul.msk.f32.gmra.mxu2 %vm171_vm1, %v739_v27 }
 0x866   :  { %v1363_v56 = vpop.eup %1362 }
 0x867   :  { %v599_v57 = vsel %vm171_vm1, %v1363_v56, 0.0 }
 0x868   :  { %600 = vadd.xlane.f32.xlu1 %v599_v57 }
 0x86a   :  { %v1365_v59 = vpop.eup %1364 }
 0x86b   :  { %v604_v61 = vmul.f32 %v1365_v59, %v1357_v39  ;;  %v776_v62 = vpop.permute.xlu2 %775 }
 0x86c   :  { %1255 = vmatpush.xpose.msk.msrb.mxu0 %vm171_vm1, %v776_v62 }
 0x86d   :  { %1245 = vmatmul.msk.f32.vlgmr.msra.gmra.mxu0 %vm171_vm1, %v604_v61 }
 0x873   :  { %v934_v63 = vpop.permute.xlu2 %933 }
 0x87b   :  { %v1061_v0 = vpop.permute.xlu2 %1060 }
 0x87c   :  { %1274 = vmatpush.xpose.msk.msra.mxu2 %vm171_vm1, %v1061_v0 }
 0x881   :  { %773 = vrot.lane.b32.xlu1 %v1636_v25, %s1502_s6 }
 0x883   :  { %v930_v15 = vpop.permute.xlu2 %929 }
 0x889   :  { %931 = vrot.lane.b32.xlu1 %v1636_v25, %s1505_s9 }
 0x891   :  { %1056 = vrot.lane.b32.xlu1 %v1636_v25, %s1506_s10 }
 0x8db   :  { %v601_v18 = vpop.xlane.xlu1 %600 }
 0x8dc   :  { %1366 = vrcp.f32 %v601_v18 }
 0x8e0   :  { %v763_v3 = vpop.f32.mrf.mxu2 }
 0x8e1   :  { %1263 = vmatmul.msk.f32.vlgmr.msrb.gmra.mxu2 %vm171_vm1, %v763_v3 }
 0x8e2   :  { %v1367_v6 = vpop.eup %1366 }
 0x8e3   :  { %v605_v7 = vmul.f32 %v1367_v6, %v1363_v56 }
 0x8e5   :  { %1246 = vmatmul.msk.f32.gmra.mxu0 %vm171_vm1, %v605_v7 }
 0x8e8   :  { %v766_v8 = vpop.f32.mrf.mxu2 }
 0x8e9   :  { %1264 = vmatmul.msk.f32.gmra.mxu2 %vm171_vm1, %v766_v8 }
 0x8ea   :  { %v635_v25 = vpop.f32.mrf.mxu0 }
 0x8eb   :  { %1247 = vmatmul.msk.f32.vlgmr.msra.gmra.mxu1 %vm171_vm1, %v635_v25 }
 0x8f3   :  { %v774_v10 = vpop.permute.xlu1 %773 }
 0x8f4   :  { %1256 = vmatpush.xpose.msk.msrb.mxu0 %vm171_vm1, %v774_v10 }
 0x8f7   :  { %1257 = vmatmul.msk.f32.vlgmr.msrb.gmra.mxu0 %vm171_vm1, %v770_v44  ;;  %v1312_v44 = vpack.i.bf16 %v1663_v55, %v1667_v60 }
 0x8f8   :  { %1265 = vmatpush.xpose.msk.msra.mxu0 %vm171_vm1, %v934_v63 }
 0x8fb   :  { %v932_v11 = vpop.permute.xlu1 %931 }
 0x8fc   :  { %1266 = vmatpush.xpose.msk.msra.mxu0 %vm171_vm1, %v932_v11 }
 0x8ff   :  { %1258 = vmatmul.msk.f32.gmra.mxu0 %vm171_vm1, %v772_v19 }
 0x903   :  { %v1057_v13 = vpop.permute.xlu1 %1056 }
 0x904   :  { %1275 = vmatmul.msk.f32.vlgmr.msra.gmra.mxu2 %vm171_vm1, %v1057_v13 }
 0x907   :  { %1267 = vmatmul.msk.f32.vlgmr.msra.gmra.mxu0 %vm171_vm1, %v928_v12 }
 0x90c   :  { %1276 = vmatmul.msk.f32.gmra.mxu2 %vm171_vm1, %v1059_v14 }
 0x90f   :  { %1268 = vmatmul.msk.f32.gmra.mxu0 %vm171_vm1, %v930_v15 }
 0x962   :  { %v638_v16 = vpop.f32.mrf.mxu0 }
 0x963   :  { %1248 = vmatmul.msk.f32.gmra.mxu1 %vm171_vm1, %v638_v16 }
 0x964   :  { %v1766_v26 = vpop.f32.mrf.mxu2 }
 0x968   :  { %v664_v22 = vpop.f32.mrf.mxu1 }
 0x969   :  { %v670_v23 = vadd.f32 %v664_v22, %v541_v20 }
 0x96b   :  { %v675_v58 = vadd.f32 %v1762_v21, %v670_v23 }
 0x96c   :  { %v1769_v5 = vpop.f32.mrf.mxu2 }
 0x96d   :  { %677 = vst.msk [vmem:[#allocation8] sm:$0xff] %vm94_vm0, %v675_v58 }
 0x974   :  { %v802_v24 = vpop.f32.mrf.mxu0 }
 0x975   :  { %v808_v28 = vmul.f32 0.25, %v802_v24 }
 0x977   :  { %v810_v29 = vsel %vm171_vm1, %v808_v28, -inf }
 0x978   :  { %811 = vmax.xlane.f32.xlu1 %v810_v29 }
 0x97c   :  { %v805_v33 = vpop.f32.mrf.mxu0 }
 0x97d   :  { %v809_v4 = vmul.f32 0.25, %v805_v33 }
 0x97f   :  { %v813_v30 = vsel %vm171_vm1, %v809_v4, -inf }
 0x980   :  { %814 = vmax.xlane.f32.xlu2 %v813_v30 }
 0x984   :  { %v960_v31 = vpop.f32.mrf.mxu0 }
 0x985   :  { %v966_v32 = vmul.f32 0.25, %v960_v31 }
 0x987   :  { %v1089_v34 = vpop.f32.mrf.mxu2  ;;  %v968_v35 = vsel %vm171_vm1, %v966_v32, -inf }
 0x988   :  { %v1095_v36 = vmul.f32 0.25, %v1089_v34  ;;  %969 = vmax.xlane.f32.xlu0 %v968_v35 }
 0x98a   :  { %v1097_v37 = vsel %vm171_vm1, %v1095_v36, -inf }
 0x98b   :  { %1098 = vmax.xlane.f32.xlu2 %v1097_v37 }
 0x98c   :  { %v963_v38 = vpop.f32.mrf.mxu0 }
 0x98d   :  { %v967_v39 = vmul.f32 0.25, %v963_v38 }
 0x98f   :  { %v1092_v40 = vpop.f32.mrf.mxu2  ;;  %v971_v41 = vsel %vm171_vm1, %v967_v39, -inf }
 0x990   :  { %v1096_v42 = vmul.f32 0.25, %v1092_v40  ;;  %972 = vmax.xlane.f32.xlu1 %v971_v41 }
 0x992   :  { %v1100_v43 = vsel %vm171_vm1, %v1096_v42, -inf }
 0x993   :  { %1101 = vmax.xlane.f32.xlu0 %v1100_v43 }
 0x9a3   :  { %1313 = vrot.lane.b32.xlu2 %v1312_v44, %s1503_s7 }
 0x9ab   :  { %1323 = vrot.lane.b32.xlu2 %v1312_v44, %s1506_s10 }
 0x9e0   :  { %v667_v19 = vpop.f32.mrf.mxu1 }
 0x9e1   :  { %v671_v45 = vadd.f32 %v667_v19, %v1694_v9 }
 0x9e3   :  { %v676_v46 = vadd.f32 %v1762_v21, %v671_v45 }
 0x9e5   :  { %678 = vst.msk [vmem:[#allocation8 + $0x8] sm:$0xff] %vm94_vm0, %v676_v46 }
 0x9eb   :  { %v812_v47 = vpop.xlane.xlu1 %811 }
 0x9ec   :  { %v816_v48 = vsub.f32 %v808_v28, %v812_v47 }
 0x9ee   :  { %v818_v49 = vmul.f32 1.442695, %v816_v48 }
 0x9f0   :  { %1368 = vpow2.f32 %v818_v49 }
 0x9f3   :  { %v815_v50 = vpop.xlane.xlu2 %814 }
 0x9f4   :  { %v817_v51 = vsub.f32 %v809_v4, %v815_v50 }
 0x9f6   :  { %v1369_v52 = vpop.eup %1368  ;;  %v820_v53 = vmul.f32 1.442695, %v817_v51 }
 0x9f7   :  { %v822_v55 = vsel %vm171_vm1, %v1369_v52, 0.0 }
 0x9f8   :  { %1370 = vpow2.f32 %v820_v53  ;;  %823 = vadd.xlane.f32.xlu1 %v822_v55 }
 0x9fb   :  { %v970_v60 = vpop.xlane.xlu0 %969 }
 0x9fc   :  { %v974_v54 = vsub.f32 %v966_v32, %v970_v60 }
 0x9fe   :  { %v1371_v27 = vpop.eup %1370  ;;  %v976_v9 = vmul.f32 1.442695, %v974_v54  ;;  %v1099_v56 = vpop.xlane.xlu2 %1098 }
 0x9ff   :  { %v825_v57 = vsel %vm171_vm1, %v1371_v27, 0.0  ;;  %v1103_v63 = vsub.f32 %v1095_v36, %v1099_v56 }
 0xa00   :  { %1372 = vpow2.f32 %v976_v9  ;;  %826 = vadd.xlane.f32.xlu0 %v825_v57 }
 0xa01   :  { %v1105_v8 = vmul.f32 1.442695, %v1103_v63 }
 0xa03   :  { %v973_v59 = vpop.xlane.xlu1 %972 }
 0xa04   :  { %v975_v61 = vsub.f32 %v967_v39, %v973_v59 }
 0xa06   :  { %v1373_v62 = vpop.eup %1372  ;;  %v978_v0 = vmul.f32 1.442695, %v975_v61  ;;  %v1314_v18 = vpop.permute.xlu2 %1313 }
 0xa07   :  { %v1315_v3 = vunpack.i.l.bf16 %v1314_v18  ;;  %v980_v6 = vsel %vm171_vm1, %v1373_v62, 0.0  ;;  %v1316_v7 = vunpack.i.h.bf16 %v1314_v18  ;;  %v1102_v25 = vpop.xlane.xlu0 %1101 }
 0xa08   :  { %1374 = vpow2.f32 %v978_v0  ;;  %981 = vadd.xlane.f32.xlu1 %v980_v6  ;;  %v1104_v11 = vsub.f32 %v1096_v42, %v1102_v25 }
 0xa09   :  { %860 = vmatpush.msrb.mxu1 %v1315_v3  ;;  %1376 = vpow2.f32 %v1105_v8 }
 0xa0a   :  { %v1107_v16 = vmul.f32 1.442695, %v1104_v11 }
 0xa0b   :  { %861 = vmatpush.msrb.mxu1 %v1316_v7 }
 0xa0c   :  { %1378 = vpow2.f32 %v1107_v16 }
 0xa0e   :  { %v1375_v10 = vpop.eup %1374  ;;  %v1324_v12 = vpop.permute.xlu2 %1323 }
 0xa0f   :  { %v1325_v13 = vunpack.i.l.bf16 %v1324_v12  ;;  %v983_v14 = vsel %vm171_vm1, %v1375_v10, 0.0  ;;  %v1326_v15 = vunpack.i.h.bf16 %v1324_v12  ;;  %v1377_v17 = vpop.eup %1376 }
 0xa10   :  { %984 = vadd.xlane.f32.xlu1 %v983_v14  ;;  %v1109_v20 = vsel %vm171_vm1, %v1377_v17, 0.0 }
 0xa11   :  { %1145 = vmatpush.msrb.mxu0 %v1325_v13 }
 0xa12   :  { %v1379_v22 = vpop.eup %1378 }
 0xa13   :  { %1146 = vmatpush.msrb.mxu0 %v1326_v15  ;;  %v1112_v23 = vsel %vm171_vm1, %v1379_v22, 0.0 }
 0xa14   :  { %1318 = vrot.lane.b32.xlu0 %v1312_v44, %s1504_s8 }
 0xa18   :  { %1110 = vadd.xlane.f32.xlu1 %v1109_v20 }
 0xa20   :  { %1113 = vadd.xlane.f32.xlu1 %v1112_v23 }
 0xa6b   :  { %v824_v58 = vpop.xlane.xlu1 %823 }
 0xa6c   :  { %1380 = vrcp.f32 %v824_v58 }
 0xa72   :  { %v1381_v24 = vpop.eup %1380 }
 0xa73   :  { %v830_v28 = vmul.f32 %v1381_v24, %v1369_v52  ;;  %v827_v29 = vpop.xlane.xlu0 %826 }
 0xa74   :  { %1382 = vrcp.f32 %v827_v29 }
 0xa75   :  { %1259 = vmatmul.msk.f32.vlgmr.msrb.gmra.mxu1 %vm171_vm1, %v830_v28 }
 0xa7a   :  { %v1383_v33 = vpop.eup %1382 }
 0xa7b   :  { %v982_v4 = vpop.xlane.xlu1 %981  ;;  %v831_v30 = vmul.f32 %v1383_v33, %v1371_v27 }
 0xa7c   :  { %1384 = vrcp.f32 %v982_v4 }
 0xa7d   :  { %1260 = vmatmul.msk.f32.gmra.mxu1 %vm171_vm1, %v831_v30 }
 0xa82   :  { %v1385_v34 = vpop.eup %1384 }
 0xa83   :  { %v985_v31 = vpop.xlane.xlu1 %984  ;;  %v988_v37 = vmul.f32 %v1385_v34, %v1373_v62 }
 0xa84   :  { %1386 = vrcp.f32 %v985_v31 }
 0xa86   :  { %v1319_v32 = vpop.permute.xlu0 %1318 }
 0xa87   :  { %v1320_v35 = vunpack.i.l.bf16 %v1319_v32  ;;  %v1321_v36 = vunpack.i.h.bf16 %v1319_v32 }
 0xa89   :  { %1016 = vmatpush.msra.mxu1 %v1320_v35 }
 0xa8a   :  { %v1387_v39 = vpop.eup %1386 }
 0xa8b   :  { %v1111_v38 = vpop.xlane.xlu1 %1110  ;;  %1017 = vmatpush.msra.mxu1 %v1321_v36  ;;  %v989_v41 = vmul.f32 %v1387_v39, %v1375_v10 }
 0xa8c   :  { %1388 = vrcp.f32 %v1111_v38  ;;  %1269 = vmatmul.msk.f32.vlgmr.msra.gmra.mxu1 %vm171_vm1, %v988_v37 }
 0xa8d   :  { %1174 = vmatpush.msrb.mxu1 %v1736_v1 }
 0xa8f   :  { %1175 = vmatpush.msrb.mxu1 %v1739_v2 }
 0xa92   :  { %v1389_v40 = vpop.eup %1388 }
 0xa93   :  { %v1117_v42 = vmul.f32 %v1389_v40, %v1377_v17  ;;  %v1114_v43 = vpop.xlane.xlu1 %1113 }
 0xa94   :  { %1390 = vrcp.f32 %v1114_v43  ;;  %1270 = vmatmul.msk.f32.gmra.mxu1 %vm171_vm1, %v989_v41 }
 0xa95   :  { %1277 = vmatmul.msk.f32.vlgmr.msrb.gmra.mxu0 %vm171_vm1, %v1117_v42 }
 0xa9a   :  { %v1391_v44 = vpop.eup %1390 }
 0xa9b   :  { %v1118_v19 = vmul.f32 %v1391_v44, %v1379_v22 }
 0xa9d   :  { %1278 = vmatmul.msk.f32.gmra.mxu0 %vm171_vm1, %v1118_v19 }
 0xaf2   :  { %v863_v45 = vpop.f32.mrf.mxu1 }
 0xaf3   :  { %1261 = vmatmul.msk.f32.vlgmr.msra.gmra.mxu3 %vm171_vm1, %v863_v45 }
 0xafa   :  { %v866_v1 = vpop.f32.mrf.mxu1 }
 0xafb   :  { %1262 = vmatmul.msk.f32.gmra.mxu3 %vm171_vm1, %v866_v1 }
 0xb09   :  { %v1019_v2 = vpop.f32.mrf.mxu1 }
 0xb0a   :  { %1271 = vmatmul.msk.f32.vlgmr.msrb.gmra.mxu3 %vm171_vm1, %v1019_v2 }
 0xb11   :  { %v1022_v46 = vpop.f32.mrf.mxu1 }
 0xb12   :  { %1272 = vmatmul.msk.f32.gmra.mxu3 %vm171_vm1, %v1022_v46  ;;  %v1148_v47 = vpop.f32.mrf.mxu0 }
 0xb13   :  { %1279 = vmatmul.msk.f32.vlgmr.msrb.gmra.mxu1 %vm171_vm1, %v1148_v47 }
 0xb1a   :  { %v1151_v48 = vpop.f32.mrf.mxu0 }
 0xb1b   :  { %1280 = vmatmul.msk.f32.gmra.mxu1 %vm171_vm1, %v1151_v48 }
 0xb76   :  { %v892_v49 = vpop.f32.mrf.mxu3 }
 0xb77   :  { %v922_v51 = vadd.f32 %v1766_v26, %v892_v49 }
 0xb7e   :  { %v895_v50 = vpop.f32.mrf.mxu3 }
 0xb7f   :  { %v925_v27 = vadd.f32 %v1769_v5, %v895_v50 }
 0xb8d   :  { %v1048_v52 = vpop.f32.mrf.mxu3 }
 0xb8e   :  { %v1054_v53 = vadd.f32 %v1048_v52, %v922_v51 }
 0xb90   :  { %v1177_v55 = vpop.f32.mrf.mxu1 }
 0xb91   :  { %v1183_v60 = vadd.f32 %v1177_v55, %v1054_v53 }
 0xb93   :  { %v1185_v54 = vadd.f32 %v1762_v21, %v1183_v60 }
 0xb95   :  { %1187 = vst.msk [vmem:[#allocation8 + $0x10] sm:$0xff] %vm94_vm0, %v1185_v54  ;;  %v1051_v9 = vpop.f32.mrf.mxu3 }
 0xb96   :  { %v1055_v56 = vadd.f32 %v1051_v9, %v925_v27 }
 0xb98   :  { %v1180_v57 = vpop.f32.mrf.mxu1 }
 0xb99   :  { %v1184_v26 = vadd.f32 %v1180_v57, %v1055_v56 }
 0xb9b   :  { %v1186_v59 = vadd.f32 %v1762_v21, %v1184_v26 }
 0xb9d   :  { %1188 = vst.msk [vmem:[#allocation8 + $0x18] sm:$0xff] %vm94_vm0, %v1186_v59 }
 0xb9e   :  { %1201 = dma.vmem_to_hbm [thread:$0]  %s1194_s13, 512, %s1196_s16, [#allocation4], %s1498_s27, %s1498_s27, %s1499_s28  }
 0xb9f   :  { %1492 = dma.done.wait [#allocation4], 512  }
 0xba0   :  { %1493 = vsyncadd [#allocation4], 4294966784 }
 0xba1   :  { %1206 = vsyncpa [#allocation3], 1 }
 0xba2   :  { %1207 = vsyncpa [#allocation6], 1 }
 0xba3   :  { %1208 = vsyncpa [#allocation4], 1 }

</bundles_post_ra>
